<compile_context>
chip_gen: v7x
topology: tpu7x:2x2x1
jax: 0.10.0
libtpu: 0.0.40
codegen_flags: <defaults>
</compile_context>

<pallas_src>
import functools

import jax
import jax.numpy as jnp
from jax.experimental import pallas as pl
from jax.experimental.pallas import tpu as pltpu


def _round_up(n, m):
    return ((n + m - 1) // m) * m


# ----------------------------------------------------------------------------
# Pallas kernel: fused i2h -> ReLU -> h2o, tiled over (batch, hidden-chunk)
# ----------------------------------------------------------------------------
def _mlp_kernel(x_ref, w1t_ref, b1_ref, w2t_ref, b2_ref, o_ref, acc_ref):
    """One (batch-tile, hidden-chunk) grid step.

    x_ref   : (bm, Dinp)  bf16 activation tile
    w1t_ref : (Dinp, bh)  bf16 i2h weight chunk (pre-transposed)
    b1_ref  : (1, bh)     f32 i2h bias chunk
    w2t_ref : (bh, Op)    bf16 h2o weight chunk (pre-transposed)
    b2_ref  : (1, Op)     f32 h2o bias
    o_ref   : (bm, Op)    output tile (written on last hidden chunk)
    acc_ref : (bm, Op)    f32 accumulator scratch
    """
    h_idx = pl.program_id(1)

    @pl.when(h_idx == 0)
    def _():
        acc_ref[...] = jnp.zeros_like(acc_ref)

    # hidden chunk = relu(x @ W1^T + b1): bf16 MXU operands, f32 epilogue.
    h = jnp.dot(x_ref[...], w1t_ref[...], preferred_element_type=jnp.float32)
    h = jnp.maximum(h + b1_ref[...], 0.0)

    # accumulate h_chunk @ W2^T_chunk into the f32 scratch.
    acc_ref[...] += jnp.dot(
        h.astype(jnp.bfloat16), w2t_ref[...], preferred_element_type=jnp.float32
    )

    @pl.when(h_idx == pl.num_programs(1) - 1)
    def _():
        o_ref[...] = (acc_ref[...] + b2_ref[...]).astype(o_ref.dtype)


# ----------------------------------------------------------------------------
# One-time parameter prep: transpose, zero-pad to 128-multiples, cast to bf16
# ----------------------------------------------------------------------------
def prepare_params(w1, b1, w2, b2):
    """w1: (H, Din), b1: (H,), w2: (O, H), b2: (O,) — PyTorch Linear layout."""
    H, Din = w1.shape
    O = w2.shape[0]
    Dinp = _round_up(Din, 128)
    Hp = _round_up(H, 128)
    Op = _round_up(O, 128)

    w1t = jnp.zeros((Dinp, Hp), jnp.bfloat16).at[:Din, :H].set(
        jnp.transpose(w1).astype(jnp.bfloat16)
    )
    b1p = jnp.zeros((1, Hp), jnp.float32).at[0, :H].set(b1.astype(jnp.float32))
    w2t = jnp.zeros((Hp, Op), jnp.bfloat16).at[:H, :O].set(
        jnp.transpose(w2).astype(jnp.bfloat16)
    )
    b2p = jnp.zeros((1, Op), jnp.float32).at[0, :O].set(b2.astype(jnp.float32))
    return w1t, b1p, w2t, b2p


# ----------------------------------------------------------------------------
# Forward wrapper
# ----------------------------------------------------------------------------
@functools.partial(jax.jit, static_argnames=("out_features", "block_b"))
def mlp_forward(x, w1t, b1p, w2t, b2p, *, out_features, block_b=256):
    """x: (B, Din) float. Params must come from prepare_params()."""
    B, Din = x.shape
    Dinp, Hp = w1t.shape
    Op = w2t.shape[1]
    out_dtype = x.dtype
    out_bytes = jnp.dtype(out_dtype).itemsize

    # --- batch tile: multiple of 8; >= 2 grid steps when possible (v7x TCs)
    if B <= 8:
        bm = _round_up(max(B, 1), 8)
    else:
        bm = max(8, min(block_b, _round_up(-(-B // 2), 8)))
    Bp = _round_up(B, bm)

    # --- hidden chunk: bound the live (bm, bh) intermediate
    if Hp <= 512:
        bh = Hp
    elif Hp % 512 == 0:
        bh = 512
    elif Hp % 256 == 0:
        bh = 256
    else:
        bh = 128

    # --- pad + cast the activation once (bf16 MXU operand)
    xp = jnp.zeros((Bp, Dinp), jnp.bfloat16).at[:B, :Din].set(
        x.astype(jnp.bfloat16)
    )

    grid = (Bp // bm, Hp // bh)

    # --- explicit VMEM budget (double-buffered blocks + accumulator) + headroom
    vmem_bytes = (
        2 * (bm * Dinp * 2)        # x tile (bf16)
        + 2 * (Dinp * bh * 2)      # w1t chunk (bf16)
        + 2 * (bh * 4)             # b1 chunk (f32)
        + 2 * (bh * Op * 2)        # w2t chunk (bf16)
        + 2 * (Op * 4)             # b2 (f32)
        + 2 * (bm * Op * out_bytes)  # output tile
        + bm * Op * 4              # accumulator scratch
    )
    vmem_limit = min(max(int(vmem_bytes * 1.5) + (2 << 20), 8 << 20), 96 << 20)

    flops = 2 * Bp * (Dinp * Hp + Hp * Op)
    bytes_accessed = (
        Bp * Dinp * 2 + Dinp * Hp * 2 + Hp * 4 + Hp * Op * 2 + Op * 4
        + Bp * Op * out_bytes
    )

    out = pl.pallas_call(
        _mlp_kernel,
        out_shape=jax.ShapeDtypeStruct((Bp, Op), out_dtype),
        grid=grid,
        in_specs=[
            pl.BlockSpec((bm, Dinp), lambda i, h: (i, 0)),   # x batch tile
            pl.BlockSpec((Dinp, bh), lambda i, h: (0, h)),   # W1^T chunk
            pl.BlockSpec((1, bh), lambda i, h: (0, h)),      # b1 chunk
            pl.BlockSpec((bh, Op), lambda i, h: (h, 0)),     # W2^T chunk
            pl.BlockSpec((1, Op), lambda i, h: (0, 0)),      # b2 (resident)
        ],
        out_specs=pl.BlockSpec((bm, Op), lambda i, h: (i, 0)),
        scratch_shapes=[pltpu.VMEM((bm, Op), jnp.float32)],
        compiler_params=pltpu.CompilerParams(
            dimension_semantics=("parallel", "arbitrary"),
            vmem_limit_bytes=vmem_limit,
        ),
        cost_estimate=pl.CostEstimate(
            flops=flops, transcendentals=0, bytes_accessed=bytes_accessed
        ),
    )(xp, w1t, b1p, w2t, b2p)

    return out[:B, :out_features]


# ----------------------------------------------------------------------------
# Deterministic parameter init (PyTorch nn.Linear default uniform ranges)
# ----------------------------------------------------------------------------
def init_params(key, input_size, hidden_size, output_size):
    def linear(k, out_f, in_f):
        k1, k2 = jax.random.split(k)
        bound = 1.0 / (in_f ** 0.5)
        w = jax.random.uniform(k1, (out_f, in_f), jnp.float32, -bound, bound)
        b = jax.random.uniform(k2, (out_f,), jnp.float32, -bound, bound)
        return w, b

    k1, k2 = jax.random.split(key)
    w1, b1 = linear(k1, hidden_size, input_size)
    w2, b2 = linear(k2, output_size, hidden_size)
    return w1, b1, w2, b2


# ----------------------------------------------------------------------------
if __name__ == "__main__":
    B = 8
    INPUT_SIZE = 16
    HIDDEN = 32
    OUTPUT = 4

    key = jax.random.PRNGKey(0)
    key, kx, kp = jax.random.split(key, 3)
    x = jax.random.normal(kx, (B, INPUT_SIZE), dtype=jnp.float32)
    w1, b1, w2, b2 = init_params(kp, INPUT_SIZE, HIDDEN, OUTPUT)

    # One-time weight prep (hoisted out of the forward pass).
    w1t, b1p, w2t, b2p = prepare_params(w1, b1, w2, b2)

    out = mlp_forward(x, w1t, b1p, w2t, b2p, out_features=OUTPUT)
    out = jax.block_until_ready(out)
    assert out.shape == (B, OUTPUT), out.shape

    # Reference (pure JAX, f32). bf16 MXU operands => relaxed tolerance.
    ref = jnp.maximum(x @ w1.T + b1, 0.0) @ w2.T + b2
    assert jnp.allclose(out, ref, atol=3e-2, rtol=3e-2), float(
        jnp.max(jnp.abs(out - ref))
    )

    print("KERNEL_OK")
</pallas_src>

<mosaic_0001>
module attributes {stable_mosaic.version = 11 : i64} {
  func.func @_mlp_kernel(%arg0: i32, %arg1: i32, %arg2: memref<8x128xbf16, #tpu.memory_space<vmem>>, %arg3: memref<128x128xbf16, #tpu.memory_space<vmem>>, %arg4: memref<1x128xf32, #tpu.memory_space<vmem>>, %arg5: memref<128x128xbf16, #tpu.memory_space<vmem>>, %arg6: memref<1x128xf32, #tpu.memory_space<vmem>>, %arg7: memref<8x128xf32, #tpu.memory_space<vmem>>, %arg8: memref<8x128xf32, #tpu.memory_space<vmem>>) attributes {dimension_semantics = [#tpu.dimension_semantics<parallel>, #tpu.dimension_semantics<arbitrary>], iteration_bounds = array<i64: 1, 1>, scalar_prefetch = 0 : i64, scratch_operands = 1 : i64, tpu.core_type = #tpu.core_type<tc>, window_params = [{transform_indices = @transform_0, window_bounds = array<i64: 8, 128>}, {transform_indices = @transform_1, window_bounds = array<i64: 128, 128>}, {transform_indices = @transform_2, window_bounds = array<i64: 1, 128>}, {transform_indices = @transform_3, window_bounds = array<i64: 128, 128>}, {pipeline_mode = #tpu.pipeline_mode<synchronous>, transform_indices = @transform_4, window_bounds = array<i64: 1, 128>}, {transform_indices = @transform_5, window_bounds = array<i64: 8, 128>}]} {
    %c0_i32 = arith.constant 0 : i32
    %0 = arith.cmpi eq, %arg1, %c0_i32 : i32
    %1 = arith.extui %0 : i1 to i32
    %c0_i32_0 = arith.constant 0 : i32
    %2 = arith.cmpi ne, %1, %c0_i32_0 : i32
    scf.if %2 {
      %cst_16 = arith.constant 0.000000e+00 : f32
      %20 = vector.broadcast %cst_16 : f32 to vector<8x128xf32>
      %c0_17 = arith.constant 0 : index
      %c0_18 = arith.constant 0 : index
      %21 = vector.load %arg8[%c0_17, %c0_18] : memref<8x128xf32, #tpu.memory_space<vmem>>, vector<8x128xf32>
      tpu.vector_store %arg8[%c0_17, %c0_18], %20 {strides = array<i32>} : memref<8x128xf32, #tpu.memory_space<vmem>>, vector<8x128xf32>,
    } else {
    }
    %c0 = arith.constant 0 : index
    %c0_1 = arith.constant 0 : index
    %3 = vector.load %arg2[%c0, %c0_1] : memref<8x128xbf16, #tpu.memory_space<vmem>>, vector<8x128xbf16>
    %c0_2 = arith.constant 0 : index
    %c0_3 = arith.constant 0 : index
    %4 = vector.load %arg3[%c0_2, %c0_3] : memref<128x128xbf16, #tpu.memory_space<vmem>>, vector<128x128xbf16>
    %cst = arith.constant dense<0.000000e+00> : vector<8x128xf32>
    %5 = tpu.matmul %3, %4, %cst {dimension_numbers = #tpu.dot_dimension_numbers<[1], [0], [0], [1], [0, 0, 1, 1], [], []>} : vector<8x128xbf16>, vector<128x128xbf16>, vector<8x128xf32> -> vector<8x128xf32>
    %c0_4 = arith.constant 0 : index
    %c0_5 = arith.constant 0 : index
    %6 = vector.load %arg4[%c0_4, %c0_5] : memref<1x128xf32, #tpu.memory_space<vmem>>, vector<1x128xf32>
    %7 = vector.broadcast %6 : vector<1x128xf32> to vector<8x128xf32>
    %8 = arith.addf %5, %7 : vector<8x128xf32>
    %cst_6 = arith.constant 0.000000e+00 : f32
    %9 = vector.broadcast %cst_6 : f32 to vector<8x128xf32>
    %10 = arith.maximumf %8, %9 : vector<8x128xf32>
    %c0_7 = arith.constant 0 : index
    %c0_8 = arith.constant 0 : index
    %11 = vector.load %arg8[%c0_7, %c0_8] : memref<8x128xf32, #tpu.memory_space<vmem>>, vector<8x128xf32>
    %12 = arith.truncf %10 : vector<8x128xf32> to vector<8x128xbf16>
    %c0_9 = arith.constant 0 : index
    %c0_10 = arith.constant 0 : index
    %13 = vector.load %arg5[%c0_9, %c0_10] : memref<128x128xbf16, #tpu.memory_space<vmem>>, vector<128x128xbf16>
    %cst_11 = arith.constant dense<0.000000e+00> : vector<8x128xf32>
    %14 = tpu.matmul %12, %13, %cst_11 {dimension_numbers = #tpu.dot_dimension_numbers<[1], [0], [0], [1], [0, 0, 1, 1], [], []>} : vector<8x128xbf16>, vector<128x128xbf16>, vector<8x128xf32> -> vector<8x128xf32>
    %15 = arith.addf %11, %14 : vector<8x128xf32>
    %c0_12 = arith.constant 0 : index
    %c0_13 = arith.constant 0 : index
    %16 = vector.load %arg8[%c0_12, %c0_13] : memref<8x128xf32, #tpu.memory_space<vmem>>, vector<8x128xf32>
    tpu.vector_store %arg8[%c0_12, %c0_13], %15 {strides = array<i32>} : memref<8x128xf32, #tpu.memory_space<vmem>>, vector<8x128xf32>,
    %c0_i32_14 = arith.constant 0 : i32
    %17 = arith.cmpi eq, %arg1, %c0_i32_14 : i32
    %18 = arith.extui %17 : i1 to i32
    %c0_i32_15 = arith.constant 0 : i32
    %19 = arith.cmpi ne, %18, %c0_i32_15 : i32
    scf.if %19 {
      %c0_16 = arith.constant 0 : index
      %c0_17 = arith.constant 0 : index
      %20 = vector.load %arg8[%c0_16, %c0_17] : memref<8x128xf32, #tpu.memory_space<vmem>>, vector<8x128xf32>
      %c0_18 = arith.constant 0 : index
      %c0_19 = arith.constant 0 : index
      %21 = vector.load %arg6[%c0_18, %c0_19] : memref<1x128xf32, #tpu.memory_space<vmem>>, vector<1x128xf32>
      %22 = vector.broadcast %21 : vector<1x128xf32> to vector<8x128xf32>
      %23 = arith.addf %20, %22 : vector<8x128xf32>
      %c0_20 = arith.constant 0 : index
      %c0_21 = arith.constant 0 : index
      %24 = vector.load %arg7[%c0_20, %c0_21] : memref<8x128xf32, #tpu.memory_space<vmem>>, vector<8x128xf32>
      tpu.vector_store %arg7[%c0_20, %c0_21], %23 {strides = array<i32>} : memref<8x128xf32, #tpu.memory_space<vmem>>, vector<8x128xf32>,
    } else {
    }
    return
  }
  func.func @transform_0(%arg0: i32, %arg1: i32) -> (i32, i32) {
    %c0_i32 = arith.constant 0 : i32
    %c0_i32_0 = arith.constant 0 : i32
    return %arg0, %c0_i32 : i32, i32
  }
  func.func @transform_1(%arg0: i32, %arg1: i32) -> (i32, i32) {
    %c0_i32 = arith.constant 0 : i32
    %c0_i32_0 = arith.constant 0 : i32
    return %c0_i32, %arg1 : i32, i32
  }
  func.func @transform_2(%arg0: i32, %arg1: i32) -> (i32, i32) {
    %c0_i32 = arith.constant 0 : i32
    %c0_i32_0 = arith.constant 0 : i32
    return %c0_i32, %arg1 : i32, i32
  }
  func.func @transform_3(%arg0: i32, %arg1: i32) -> (i32, i32) {
    %c0_i32 = arith.constant 0 : i32
    %c0_i32_0 = arith.constant 0 : i32
    return %arg1, %c0_i32 : i32, i32
  }
  func.func @transform_4(%arg0: i32, %arg1: i32) -> (i32, i32) {
    %c0_i32 = arith.constant 0 : i32
    %c0_i32_0 = arith.constant 0 : i32
    %c0_i32_1 = arith.constant 0 : i32
    return %c0_i32, %c0_i32_0 : i32, i32
  }
  func.func @transform_5(%arg0: i32, %arg1: i32) -> (i32, i32) {
    %c0_i32 = arith.constant 0 : i32
    %c0_i32_0 = arith.constant 0 : i32
    return %arg0, %c0_i32 : i32, i32
  }
}

</mosaic_0001>

<bundles_post_ra>
// kernel: mlp_forward.1
= control target key start
LH: loop header
LB: loop body
LE: loop exit
PB: predicated region body
PF: predicated region fallthrough
CT: control target
= control target key end

     0   :  { %10 = vsyncpa [#allocation4], 0  ;;  %s512_s0 = inlined_call_operand.vmem [shape: bf16[8,128], index: 0, kind: input, shape index: {}]   ;;  %s513_s1 = inlined_call_operand.hbm [shape: bf16[128,128], index: 1, kind: input, shape index: {}]   ;;  %s514_s2 = inlined_call_operand.vmem [shape: f32[1,128], index: 2, kind: input, shape index: {}]   ;;  %s515_s3 = inlined_call_operand.hbm [shape: bf16[128,128], index: 3, kind: input, shape index: {}]   ;;  %s516_s4 = inlined_call_operand.vmem [shape: f32[1,128], index: 4, kind: input, shape index: {}]   ;;  %s517_s5 = inlined_call_operand.vmem [shape: f32[8,128], index: 5, kind: output, shape index: {}]  }
   0x1   :  { %11 = vsyncpa [#allocation6], 0  ;;  %s440_s18 = smov [#allocation3]   ;;  %s392_s22 = scalar_lea.hbm %s513_s1, 1024 }
   0x2   :  { %s19_s19 = sshll.u32 %s440_s18, 4  ;;  %p393_p0 = scmp.ne.s32.totalorder %s513_s1, %s392_s22  ;;  %s20_s19 = int_to_ptr.vmem [resolvable:$true] %s19_s19 }
   0x3   :  { %p396_p1 = scmp.lt.u32.totalorder %s392_s22, %s513_s1 }
   0x5   :  { %p398_p2 = pnand %p396_p1, %p393_p0 }
   0x7   :  { %401 = shalt.err (!%p398_p2)
}
   0x8   :  { %s402_s27 = scalar_lea.vmem %s20_s19, 1024  ;;  %p407_p4 = scmp.lt.s32.totalorder %s20_s19, %s20_s19 }
   0x9   :  { %p403_p3 = scmp.ne.s32.totalorder %s20_s19, %s402_s27  ;;  %p408_p5 = scmp.lt.s32.totalorder %s402_s27, %s402_s27 }
   0xb   :  { %p409_p6 = por %p408_p5, %p407_p4 }
   0xd   :  { %p410_p7 = pnand %p409_p6, %p403_p3 }
   0xf   :  { %413 = shalt.err (!%p410_p7)
}
  0x10   :  { %s441_s28 = smov 64   ;;  %s442_s29 = smov 4  }
  0x11   :  { %25 = dma.hbm_to_vmem [thread:$0]  %s513_s1, 1024, %s20_s19, [#allocation4], %s441_s28, %s441_s28, %s442_s29  }
  0x12   :  { %s443_s7 = smov [#allocation5]   ;;  %s414_s11 = scalar_lea.hbm %s515_s3, 1024 }
  0x13   :  { %s33_s8 = sshll.u32 %s443_s7, 4  ;;  %p415_p8 = scmp.ne.s32.totalorder %s515_s3, %s414_s11  ;;  %s34_s8 = int_to_ptr.vmem [resolvable:$true] %s33_s8 }
  0x14   :  { %p418_p9 = scmp.lt.u32.totalorder %s414_s11, %s515_s3 }
  0x16   :  { %p420_p10 = pnand %p418_p9, %p415_p8 }
  0x18   :  { %423 = shalt.err (!%p420_p10)
}
  0x19   :  { %s424_s16 = scalar_lea.vmem %s34_s8, 1024  ;;  %p429_p12 = scmp.lt.s32.totalorder %s34_s8, %s34_s8 }
  0x1a   :  { %p425_p11 = scmp.ne.s32.totalorder %s34_s8, %s424_s16  ;;  %p430_p13 = scmp.lt.s32.totalorder %s424_s16, %s424_s16 }
  0x1c   :  { %p431_p0 = por %p430_p13, %p429_p12 }
  0x1e   :  { %p432_p1 = pnand %p431_p0, %p425_p11 }
  0x20   :  { %435 = shalt.err (!%p432_p1)
}
  0x21   :  { %39 = dma.hbm_to_vmem [thread:$0]  %s515_s3, 1024, %s34_s8, [#allocation6], %s441_s28, %s441_s28, %s442_s29  }
  0x22   :  { %436 = dma.done.wait [#allocation4], 1024  }
  0x23   :  { %437 = vsyncadd [#allocation4], 4294966272 }
  0x24   :  { %438 = dma.done.wait [#allocation6], 1024  }
  0x25   :  { %439 = vsyncadd [#allocation6], 4294966272  ;;  %v444_v0 = vmov 0.0   ;;  %vm445_vm0 = vmmov 0   ;;  %v376_v1 = vld [vmem:[#allocation3] sm:$0xff]   ;;  %v377_v2 = vld [vmem:[#allocation3 + $0x8] sm:$0xff]  }
  0x26   :  { %330 = vmatprep.subr.bf16.mxu0 %v444_v0  ;;  %346 = vmatprep.mubr.msk.bf16.mxu0 %vm445_vm0, %v444_v0  ;;  %v378_v3 = vld [vmem:[#allocation3 + $0x10] sm:$0xff]   ;;  %v384_v4 = vld [vmem:[#allocation5] sm:$0xff]   ;;  %v379_v5 = vld [vmem:[#allocation3 + $0x18] sm:$0xff]  }
  0x27   :  { %350 = vmatprep.subr.bf16.mxu1 %v444_v0  ;;  %366 = vmatprep.mubr.msk.bf16.mxu1 %vm445_vm0, %v444_v0  ;;  %v385_v6 = vld [vmem:[#allocation5 + $0x8] sm:$0xff]   ;;  %v380_v7 = vld [vmem:[#allocation3 + $0x20] sm:$0xff]   ;;  %v386_v8 = vld [vmem:[#allocation5 + $0x10] sm:$0xff]  }
  0x28   :  { %331 = vmatpush3.bf16.msra.mxu0 %v376_v1  ;;  %351 = vmatpush3.bf16.msra.mxu1 %v384_v4  ;;  %v381_v9 = vld [vmem:[#allocation3 + $0x28] sm:$0xff]   ;;  %v387_v10 = vld [vmem:[#allocation5 + $0x18] sm:$0xff]   ;;  %v382_v11 = vld [vmem:[#allocation3 + $0x30] sm:$0xff]  }
  0x29   :  { %332 = vmatprep.subr.bf16.mxu0 %v444_v0  ;;  %352 = vmatprep.subr.bf16.mxu1 %v444_v0  ;;  %v388_v12 = vld [vmem:[#allocation5 + $0x20] sm:$0xff]   ;;  %v383_v13 = vld [vmem:[#allocation3 + $0x38] sm:$0xff]   ;;  %v389_v14 = vld [vmem:[#allocation5 + $0x28] sm:$0xff]  }
  0x2a   :  { %v54_v15 = vld [vmem:[%s512_s0] sm:$0xf]  ;;  %v390_v16 = vld [vmem:[#allocation5 + $0x30] sm:$0xff]   ;;  %v391_v17 = vld [vmem:[#allocation5 + $0x38] sm:$0xff]  }
  0x2b   :  { %v294_v18 = vld [vmem:[%s514_s2] ss:$0 sm:$0xff] }
  0x2c   :  { %333 = vmatpush3.bf16.msra.mxu0 %v377_v2  ;;  %353 = vmatpush3.bf16.msra.mxu1 %v385_v6  ;;  %v311_v26 = vld [vmem:[%s516_s4] ss:$0 sm:$0xff] }
  0x2d   :  { %334 = vmatprep.subr.bf16.mxu0 %v444_v0  ;;  %354 = vmatprep.subr.bf16.mxu1 %v444_v0 }
  0x30   :  { %335 = vmatpush3.bf16.msra.mxu0 %v378_v3  ;;  %355 = vmatpush3.bf16.msra.mxu1 %v386_v8 }
  0x31   :  { %336 = vmatprep.subr.bf16.mxu0 %v444_v0  ;;  %356 = vmatprep.subr.bf16.mxu1 %v444_v0 }
  0x34   :  { %337 = vmatpush3.bf16.msra.mxu0 %v379_v5  ;;  %357 = vmatpush3.bf16.msra.mxu1 %v387_v10 }
  0x35   :  { %338 = vmatprep.subr.bf16.mxu0 %v444_v0  ;;  %358 = vmatprep.subr.bf16.mxu1 %v444_v0 }
  0x38   :  { %339 = vmatpush3.bf16.msra.mxu0 %v380_v7  ;;  %359 = vmatpush3.bf16.msra.mxu1 %v388_v12 }
  0x39   :  { %340 = vmatprep.subr.bf16.mxu0 %v444_v0  ;;  %360 = vmatprep.subr.bf16.mxu1 %v444_v0 }
  0x3c   :  { %341 = vmatpush3.bf16.msra.mxu0 %v381_v9  ;;  %361 = vmatpush3.bf16.msra.mxu1 %v389_v14 }
  0x3d   :  { %342 = vmatprep.subr.bf16.mxu0 %v444_v0  ;;  %362 = vmatprep.subr.bf16.mxu1 %v444_v0 }
  0x40   :  { %343 = vmatpush3.bf16.msra.mxu0 %v382_v11  ;;  %363 = vmatpush3.bf16.msra.mxu1 %v390_v16 }
  0x41   :  { %344 = vmatprep.subr.bf16.mxu0 %v444_v0  ;;  %364 = vmatprep.subr.bf16.mxu1 %v444_v0 }
  0x44   :  { %345 = vmatpush3.bf16.msra.mxu0 %v383_v13  ;;  %365 = vmatpush3.bf16.msra.mxu1 %v391_v17 }
  0x47   :  { %347 = vmatmul.mubr.bf16.vlgmr.msra.gmra.mrb[0].mxu0 %v54_v15 }
 0x11a   :  { %v160_v19 = vpop.f32.mrb[0].mxu0 }
 0x11b   :  { %v161_v20 = vadd.f32 %v294_v18, %v160_v19  ;;  %v348_v21 = vpop.f32.mrb[1].mxu0 }
 0x11c   :  { %v163_v22 = vpop.f32.mrb[2].mxu0 }
 0x11d   :  { %v166_v23 = vmax.f32 %v161_v20, 0.0  ;;  %v349_v24 = vpop.f32.mrb[3].mxu0 }
 0x11f   :  { %v168_v25 = vpack.c.bf16 %v166_v23, %v166_v23 }
 0x121   :  { %367 = vmatmul.mubr.bf16.vlgmr.msra.gmra.mrb[0].mxu1 %v168_v25 }
 0x1f4   :  { %v267_v27 = vpop.f32.mrb[0].mxu1 }
 0x1f5   :  { %v286_v28 = vadd.f32 %v311_v26, %v267_v27  ;;  %v368_v29 = vpop.f32.mrb[1].mxu1 }
 0x1f6   :  { %v270_v30 = vpop.f32.mrb[2].mxu1 }
 0x1f7   :  { %287 = vst [vmem:[%s517_s5] sm:$0xff] %v286_v28  ;;  %v369_v31 = vpop.f32.mrb[3].mxu1 }
 0x1f8   :  { %292 = vsyncpa [#allocation4], 1 }
 0x1f9   :  { %293 = vsyncpa [#allocation6], 1 }

</bundles_post_ra>
